<compile_context>
chip_gen: v5e
topology: v5e:2x2
jax: 0.10.0
libtpu: 0.0.40
codegen_flags: <defaults>
</compile_context>

<pallas_src>
import jax
import jax.numpy as jnp
from jax import lax
from jax.experimental import pallas as pl
from jax.experimental.pallas import tpu as pltpu


# ----------------------------- Pallas kernel --------------------------------
def _upblock_kernel(x_ref, sd_ref, msk_ref, w1_ref, w2a_ref, w2b_ref, bn_ref,
                    out_ref):
    f32 = jnp.float32
    wc = out_ref.shape[-1]                     # W * Cout (128 lanes in the demo)

    # (ipb, H0, W0*Cin) block -> (ipb*H0, W0*Cin) row slab (squeeze when ipb==1)
    if x_ref.shape[0] == 1:
        xs = x_ref[0]
    else:
        xs = x_ref[...].reshape(sd_ref.shape[1], x_ref.shape[-1])

    bn = bn_ref[...]                           # (8, W*Cout) folded BN scale/offset rows
    m_top = msk_ref[:, 0:1]                    # per-image edge-row masks, (M, 1)
    m_bot = msk_ref[:, 1:2]

    def shift_down(t):                         # t[i-1]; zero at each image's first row
        return pltpu.roll(t, shift=1, axis=0) * m_top

    def shift_up(t):                           # t[i+1]; zero at each image's last row
        return pltpu.roll(t, shift=t.shape[0] - 1, axis=0) * m_bot

    # 2x nearest row-upsample: block-diagonal 0/1 matrix, one small MXU pass.
    t_mid = jnp.dot(sd_ref[...], xs, preferred_element_type=f32)   # (M, W0*Cin)
    t_top = shift_down(t_mid)                                      # XLU roll + mask
    t_bot = shift_up(t_mid)

    # conv_1_1 (all three vertical taps) + conv_1_2 (1x1): ONE K-concat matmul.
    # Column upsample + horizontal zero pad are folded into the banded weights.
    big1 = jnp.dot(jnp.concatenate([t_top, t_mid, t_bot], axis=1),
                   w1_ref[...], preferred_element_type=f32)        # (M, 2*W*Cout)
    y1 = jnp.maximum(big1[:, :wc] * bn[0:1] + bn[1:2], 0.0)        # BN1_1 + ReLU
    z = jnp.maximum(big1[:, wc:] * bn[4:5] + bn[5:6], 0.0)         # BN1_2 + ReLU

    # conv_2_1: ONE K-concat matmul over the three vertical taps of y1.
    acc2 = jnp.dot(jnp.concatenate([shift_down(y1), y1, shift_up(y1)], axis=1),
                   w2a_ref[...], preferred_element_type=f32)       # (M, W*Cout)
    out1 = jnp.maximum(acc2 * bn[2:3] + bn[3:4], 0.0)              # BN2_1 + ReLU

    # conv_2_2 (1x1) on branch 2.
    z2 = jnp.dot(z, w2b_ref[...], preferred_element_type=f32)
    out2 = jnp.maximum(z2 * bn[6:7] + bn[7:8], 0.0)                # BN2_2 + ReLU

    res = (out1 + out2).astype(out_ref.dtype)
    if out_ref.shape[0] == 1:
        out_ref[0] = res
    else:
        out_ref[...] = res.reshape(out_ref.shape)


# --------------------------- weight preprocessing ----------------------------
def _prep_operands(params, Cin, H0, W0, upsample, ipb):
    f32 = jnp.float32
    Cout = params["w12"].shape[1]
    s = 2 if upsample else 1
    H, W = s * H0, s * W0
    WCout = W * Cout
    W0Cin = W0 * Cin
    M = ipb * H
    eps = 1e-5

    def fold_bn(conv_b, bn):
        gamma, beta, rmean, rvar = bn
        scale = gamma / jnp.sqrt(rvar + eps)
        bias = beta + (conv_b - rmean) * scale
        # per-channel -> per (column, channel) lane position of the row slab
        return (jnp.tile(scale, W).reshape(1, WCout).astype(f32),
                jnp.tile(bias, W).reshape(1, WCout).astype(f32))

    s1a, o1a = fold_bn(params["b31"], params["bn1_1"])   # conv_1_1 + norm1_1
    s1b, o1b = fold_bn(params["b32"], params["bn2_1"])   # conv_2_1 + norm2_1
    s2a, o2a = fold_bn(params["b12"], params["bn1_2"])   # conv_1_2 + norm1_2
    s2b, o2b = fold_bn(params["b22"], params["bn2_2"])   # conv_2_2 + norm2_2
    BN = jnp.concatenate([s1a, o1a, s1b, o1b, s2a, o2a, s2b, o2b], axis=0)  # (8, W*Cout)

    # banded weight matrices: horizontal zero pad folded in via shifted eyes
    def band3x3(w_hwio, cin):
        mats = []
        for dy in range(3):
            m = jnp.zeros((W * cin, WCout), f32)
            for dx in range(3):
                m = m + jnp.kron(jnp.eye(W, W, k=1 - dx, dtype=f32), w_hwio[dy, dx])
            mats.append(m)
        return jnp.stack(mats)                            # (3, W*cin, W*Cout)

    # column (lane) nearest-upsample operator, folded into the weights
    U = jnp.repeat(jnp.eye(W0, dtype=f32), s, axis=1)     # (W0, W)
    E = jnp.kron(U, jnp.eye(Cin, dtype=f32))              # (W0*Cin, W*Cin)

    B31 = band3x3(params["w31"], Cin)
    EB31 = jnp.einsum("pk,dko->dpo", E, B31)              # (3, W0*Cin, W*Cout)
    EB12 = E @ jnp.kron(jnp.eye(W, dtype=f32), params["w12"])   # (W0*Cin, W*Cout)
    B32 = band3x3(params["w32"], Cout)                    # (3, W*Cout, W*Cout)
    B22 = jnp.kron(jnp.eye(W, dtype=f32), params["w22"])  # (W*Cout, W*Cout)

    # fused stage-1 weight: three conv_1_1 taps stacked along K, 1x1 (branch 2)
    # placed in the middle-tap rows of the second output half.
    Z = jnp.zeros((W0Cin, WCout), f32)
    W1 = jnp.concatenate([jnp.concatenate([EB31[0], Z], axis=1),
                          jnp.concatenate([EB31[1], EB12], axis=1),
                          jnp.concatenate([EB31[2], Z], axis=1)],
                         axis=0)                          # (3*W0*Cin, 2*W*Cout)
    W2a = jnp.concatenate([B32[0], B32[1], B32[2]], axis=0)   # (3*W*Cout, W*Cout)
    W2b = B22                                             # (W*Cout, W*Cout)

    # row-upsample 0/1 matrix (dy=1 tap only), block-diagonal over folded images
    SD_one = (jnp.arange(H)[:, None] // s == jnp.arange(H0)[None, :]).astype(f32)
    SD = jnp.kron(jnp.eye(ipb, dtype=f32), SD_one)        # (ipb*H, ipb*H0)

    # per-image edge-row masks for the sublane rolls: col0 = "row i-1 valid",
    # col1 = "row i+1 valid"
    r = jnp.arange(M) % H
    MSK = jnp.stack([(r != 0).astype(f32), (r != H - 1).astype(f32)], axis=1)  # (M, 2)

    return SD, MSK, W1, W2a, W2b, BN, (H, W, Cout, WCout)


# ------------------------------- entry points --------------------------------
def build_upblock(params, x_shape, upsample=True, images_per_block=None):
    """Preprocess weights once and return a jitted forward fn: NCHW -> NCHW."""
    N, Cin, H0, W0 = x_shape
    if images_per_block is None:
        # keep >= 2 parallel grid steps when possible (both v7x TensorCores);
        # on v5e/v6e (1 TC) pass images_per_block=N to fold the whole batch.
        images_per_block = N // 2 if (N >= 2 and N % 2 == 0) else 1
    ipb = images_per_block
    assert N % ipb == 0, (N, ipb)
    grid_steps = N // ipb

    SD, MSK, W1, W2a, W2b, BN, (H, W, Cout, WCout) = _prep_operands(
        params, Cin, H0, W0, upsample, ipb)
    W0Cin = W0 * Cin

    # rough double-buffered VMEM budget (last two dims padded to (8,128) tiles)
    def padded_bytes(shape):
        rup = lambda v, m: ((v + m - 1) // m) * m
        rows = rup(shape[-2], 8) if len(shape) >= 2 else 1
        cols = rup(shape[-1], 128)
        lead = 1
        for d in shape[:-2]:
            lead *= d
        return lead * rows * cols * 4
    blocks = [(ipb, H0, W0Cin), SD.shape, MSK.shape, W1.shape, W2a.shape,
              W2b.shape, BN.shape, (ipb, H, WCout)]
    vmem_est = 2 * sum(padded_bytes(s) for s in blocks)
    if vmem_est > 24 * 1024 * 1024:
        # TODO(synk): W-tiled / per-dy im2col fallback for large images — the
        # banded weights scale as O((W*Cout)^2) and would exceed v7x scoped VMEM.
        raise NotImplementedError(
            f"banded-weight UpBlock needs ~{vmem_est >> 20} MiB VMEM; "
            "use a W-tiled variant for this problem size")

    def const_spec(a):
        nd = a.ndim
        return pl.BlockSpec(a.shape, lambda n, _nd=nd: (0,) * _nd)

    consts = (SD, MSK, W1, W2a, W2b, BN)

    pallas_fn = pl.pallas_call(
        _upblock_kernel,
        out_shape=jax.ShapeDtypeStruct((N, H, WCout), jnp.float32),
        grid=(grid_steps,),
        in_specs=[pl.BlockSpec((ipb, H0, W0Cin), lambda n: (n, 0, 0))]
                 + [const_spec(a) for a in consts],
        out_specs=pl.BlockSpec((ipb, H, WCout), lambda n: (n, 0, 0)),
        compiler_params=pltpu.CompilerParams(dimension_semantics=("parallel",)),
    )

    @jax.jit
    def fwd(x_nchw):
        # only the small original tensor is touched outside the kernel: a cheap
        # channels-last row-slab view.  The 4x upsampled tensor never hits HBM.
        xs = jnp.transpose(x_nchw, (0, 2, 3, 1)).reshape(N, H0, W0Cin)
        xs = xs.astype(jnp.float32)
        out = pallas_fn(xs, *consts)
        return jnp.transpose(out.reshape(N, H, W, Cout), (0, 3, 1, 2))

    return fwd


def upblock_forward(x_nchw, params, upsample=True, images_per_block=None):
    """One-shot convenience wrapper (re-does the weight prep each call)."""
    return build_upblock(params, x_nchw.shape, upsample, images_per_block)(x_nchw)


# ---------------- pure-JAX reference (for correctness check) ----------------
def upblock_reference(x_nchw, params, upsample=True):
    x = x_nchw
    if upsample:
        x = jnp.repeat(jnp.repeat(x, 2, axis=2), 2, axis=3)
    eps = 1e-5

    def conv(x, w_hwio, b, pad):
        y = lax.conv_general_dilated(x, w_hwio, (1, 1), pad,
                                     dimension_numbers=("NCHW", "HWIO", "NCHW"))
        return y + b.reshape(1, -1, 1, 1)

    def bn(x, p):
        gamma, beta, rmean, rvar = (v.reshape(1, -1, 1, 1) for v in p)
        return (x - rmean) / jnp.sqrt(rvar + eps) * gamma + beta

    relu = lambda v: jnp.maximum(v, 0.0)
    Cin = params["w12"].shape[0]
    Cout = params["w12"].shape[1]

    y1 = relu(bn(conv(x, params["w31"], params["b31"], [(1, 1), (1, 1)]), params["bn1_1"]))
    y1 = relu(bn(conv(y1, params["w32"], params["b32"], [(1, 1), (1, 1)]), params["bn2_1"]))
    y2 = relu(bn(conv(x, params["w12"].reshape(1, 1, Cin, Cout), params["b12"],
                      [(0, 0), (0, 0)]), params["bn1_2"]))
    y2 = relu(bn(conv(y2, params["w22"].reshape(1, 1, Cout, Cout), params["b22"],
                      [(0, 0), (0, 0)]), params["bn2_2"]))
    return y1 + y2


def make_params(key, in_features, out_features):
    ks = jax.random.split(key, 16)
    f32 = jnp.float32

    def bn_params(k):
        k1, k2, k3, k4 = jax.random.split(k, 4)
        gamma = 1.0 + 0.1 * jax.random.normal(k1, (out_features,), f32)
        beta = 0.1 * jax.random.normal(k2, (out_features,), f32)
        rmean = 0.1 * jax.random.normal(k3, (out_features,), f32)
        rvar = 0.5 + jnp.abs(jax.random.normal(k4, (out_features,), f32))
        return (gamma, beta, rmean, rvar)

    return {
        "w31": 0.1 * jax.random.normal(ks[0], (3, 3, in_features, out_features), f32),
        "b31": 0.1 * jax.random.normal(ks[1], (out_features,), f32),
        "w32": 0.1 * jax.random.normal(ks[2], (3, 3, out_features, out_features), f32),
        "b32": 0.1 * jax.random.normal(ks[3], (out_features,), f32),
        "w12": 0.1 * jax.random.normal(ks[4], (in_features, out_features), f32),
        "b12": 0.1 * jax.random.normal(ks[5], (out_features,), f32),
        "w22": 0.1 * jax.random.normal(ks[6], (out_features, out_features), f32),
        "b22": 0.1 * jax.random.normal(ks[7], (out_features,), f32),
        "bn1_1": bn_params(ks[8]),
        "bn2_1": bn_params(ks[9]),
        "bn1_2": bn_params(ks[10]),
        "bn2_2": bn_params(ks[11]),
    }


if __name__ == "__main__":
    key = jax.random.PRNGKey(0)
    k_x, k_p = jax.random.split(key)

    N, Cin, Cout, H0, W0 = 2, 4, 8, 8, 8   # upsample -> 16x16 spatial, W*Cout = 128 lanes
    x = jax.random.normal(k_x, (N, Cin, H0, W0), jnp.float32)
    params = make_params(k_p, Cin, Cout)

    fwd = build_upblock(params, x.shape, upsample=True)   # weight prep hoisted (runs once)
    out = jax.block_until_ready(fwd(x))

    ref = jax.block_until_ready(upblock_reference(x, params, upsample=True))
    assert out.shape == (N, Cout, 2 * H0, 2 * W0), out.shape
    max_err = float(jnp.max(jnp.abs(out - ref)))
    assert jnp.allclose(out, ref, atol=2e-3, rtol=2e-3), max_err

    print("KERNEL_OK")
</pallas_src>

<mosaic_0001>
module attributes {stable_mosaic.version = 11 : i64} {
  func.func @_upblock_kernel(%arg0: i32, %arg1: memref<1x8x32xf32, #tpu.memory_space<vmem>>, %arg2: memref<16x8xf32, #tpu.memory_space<vmem>>, %arg3: memref<16x2xf32, #tpu.memory_space<vmem>>, %arg4: memref<96x256xf32, #tpu.memory_space<vmem>>, %arg5: memref<384x128xf32, #tpu.memory_space<vmem>>, %arg6: memref<128x128xf32, #tpu.memory_space<vmem>>, %arg7: memref<8x128xf32, #tpu.memory_space<vmem>>, %arg8: memref<1x16x128xf32, #tpu.memory_space<vmem>>) attributes {dimension_semantics = [#tpu.dimension_semantics<parallel>], iteration_bounds = array<i64: 2>, scalar_prefetch = 0 : i64, scratch_operands = 0 : i64, tpu.core_type = #tpu.core_type<tc>, window_params = [{transform_indices = @transform_0, window_bounds = array<i64: 1, 8, 32>}, {pipeline_mode = #tpu.pipeline_mode<synchronous>, transform_indices = @transform_1, window_bounds = array<i64: 16, 8>}, {pipeline_mode = #tpu.pipeline_mode<synchronous>, transform_indices = @transform_2, window_bounds = array<i64: 16, 2>}, {pipeline_mode = #tpu.pipeline_mode<synchronous>, transform_indices = @transform_3, window_bounds = array<i64: 96, 256>}, {pipeline_mode = #tpu.pipeline_mode<synchronous>, transform_indices = @transform_4, window_bounds = array<i64: 384, 128>}, {pipeline_mode = #tpu.pipeline_mode<synchronous>, transform_indices = @transform_5, window_bounds = array<i64: 128, 128>}, {pipeline_mode = #tpu.pipeline_mode<synchronous>, transform_indices = @transform_6, window_bounds = array<i64: 8, 128>}, {transform_indices = @transform_7, window_bounds = array<i64: 1, 16, 128>}]} {
    %c0 = arith.constant 0 : index
    %c0_0 = arith.constant 0 : index
    %c0_1 = arith.constant 0 : index
    %0 = vector.load %arg1[%c0, %c0_0, %c0_1] : memref<1x8x32xf32, #tpu.memory_space<vmem>>, vector<1x8x32xf32>
    %1 = vector.shape_cast %0 : vector<1x8x32xf32> to vector<8x32xf32>
    %c0_2 = arith.constant 0 : index
    %c0_3 = arith.constant 0 : index
    %2 = vector.load %arg7[%c0_2, %c0_3] : memref<8x128xf32, #tpu.memory_space<vmem>>, vector<8x128xf32>
    %c0_4 = arith.constant 0 : index
    %c0_5 = arith.constant 0 : index
    %3 = vector.load %arg3[%c0_4, %c0_5] : memref<16x2xf32, #tpu.memory_space<vmem>>, vector<16x1xf32>
    %c0_6 = arith.constant 0 : index
    %c1 = arith.constant 1 : index
    %4 = vector.load %arg3[%c0_6, %c1] : memref<16x2xf32, #tpu.memory_space<vmem>>, vector<16x1xf32>
    %c0_7 = arith.constant 0 : index
    %c0_8 = arith.constant 0 : index
    %5 = vector.load %arg2[%c0_7, %c0_8] : memref<16x8xf32, #tpu.memory_space<vmem>>, vector<16x8xf32>
    %cst = arith.constant dense<0.000000e+00> : vector<16x32xf32>
    %6 = tpu.matmul %5, %1, %cst {dimension_numbers = #tpu.dot_dimension_numbers<[1], [0], [0], [1], [0, 0, 1, 1], [], []>} : vector<16x8xf32>, vector<8x32xf32>, vector<16x32xf32> -> vector<16x32xf32>
    %c1_i32 = arith.constant 1 : i32
    %7 = tpu.dynamic_rotate %6 by %c1_i32 dim 0 : vector<16x32xf32>, i32 -> vector<16x32xf32>
    %8 = vector.broadcast %3 : vector<16x1xf32> to vector<16x32xf32>
    %9 = arith.mulf %7, %8 : vector<16x32xf32>
    %c15_i32 = arith.constant 15 : i32
    %10 = tpu.dynamic_rotate %6 by %c15_i32 dim 0 : vector<16x32xf32>, i32 -> vector<16x32xf32>
    %11 = vector.broadcast %4 : vector<16x1xf32> to vector<16x32xf32>
    %12 = arith.mulf %10, %11 : vector<16x32xf32>
    %13 = tpu.concatenate %9, %6, %12 in 1 : vector<16x32xf32>, vector<16x32xf32>, vector<16x32xf32> -> vector<16x96xf32>
    %c0_9 = arith.constant 0 : index
    %c0_10 = arith.constant 0 : index
    %14 = vector.load %arg4[%c0_9, %c0_10] : memref<96x256xf32, #tpu.memory_space<vmem>>, vector<96x256xf32>
    %cst_11 = arith.constant dense<0.000000e+00> : vector<16x256xf32>
    %15 = tpu.matmul %13, %14, %cst_11 {dimension_numbers = #tpu.dot_dimension_numbers<[1], [0], [0], [1], [0, 0, 1, 1], [], []>} : vector<16x96xf32>, vector<96x256xf32>, vector<16x256xf32> -> vector<16x256xf32>
    %16 = vector.extract_strided_slice %15 {offsets = [0, 0], sizes = [16, 128], strides = [1, 1]} : vector<16x256xf32> to vector<16x128xf32>
    %17 = vector.extract_strided_slice %2 {offsets = [0, 0], sizes = [1, 128], strides = [1, 1]} : vector<8x128xf32> to vector<1x128xf32>
    %18 = vector.broadcast %17 : vector<1x128xf32> to vector<16x128xf32>
    %19 = arith.mulf %16, %18 : vector<16x128xf32>
    %20 = vector.extract_strided_slice %2 {offsets = [1, 0], sizes = [1, 128], strides = [1, 1]} : vector<8x128xf32> to vector<1x128xf32>
    %21 = vector.broadcast %20 : vector<1x128xf32> to vector<16x128xf32>
    %22 = arith.addf %19, %21 : vector<16x128xf32>
    %cst_12 = arith.constant 0.000000e+00 : f32
    %23 = vector.broadcast %cst_12 : f32 to vector<16x128xf32>
    %24 = arith.maximumf %22, %23 : vector<16x128xf32>
    %25 = vector.extract_strided_slice %15 {offsets = [0, 128], sizes = [16, 128], strides = [1, 1]} : vector<16x256xf32> to vector<16x128xf32>
    %26 = vector.extract_strided_slice %2 {offsets = [4, 0], sizes = [1, 128], strides = [1, 1]} : vector<8x128xf32> to vector<1x128xf32>
    %27 = vector.broadcast %26 : vector<1x128xf32> to vector<16x128xf32>
    %28 = arith.mulf %25, %27 : vector<16x128xf32>
    %29 = vector.extract_strided_slice %2 {offsets = [5, 0], sizes = [1, 128], strides = [1, 1]} : vector<8x128xf32> to vector<1x128xf32>
    %30 = vector.broadcast %29 : vector<1x128xf32> to vector<16x128xf32>
    %31 = arith.addf %28, %30 : vector<16x128xf32>
    %cst_13 = arith.constant 0.000000e+00 : f32
    %32 = vector.broadcast %cst_13 : f32 to vector<16x128xf32>
    %33 = arith.maximumf %31, %32 : vector<16x128xf32>
    %c1_i32_14 = arith.constant 1 : i32
    %34 = tpu.dynamic_rotate %24 by %c1_i32_14 dim 0 : vector<16x128xf32>, i32 -> vector<16x128xf32>
    %35 = vector.broadcast %3 : vector<16x1xf32> to vector<16x128xf32>
    %36 = arith.mulf %34, %35 : vector<16x128xf32>
    %c15_i32_15 = arith.constant 15 : i32
    %37 = tpu.dynamic_rotate %24 by %c15_i32_15 dim 0 : vector<16x128xf32>, i32 -> vector<16x128xf32>
    %38 = vector.broadcast %4 : vector<16x1xf32> to vector<16x128xf32>
    %39 = arith.mulf %37, %38 : vector<16x128xf32>
    %40 = tpu.concatenate %36, %24, %39 in 1 : vector<16x128xf32>, vector<16x128xf32>, vector<16x128xf32> -> vector<16x384xf32>
    %c0_16 = arith.constant 0 : index
    %c0_17 = arith.constant 0 : index
    %41 = vector.load %arg5[%c0_16, %c0_17] : memref<384x128xf32, #tpu.memory_space<vmem>>, vector<384x128xf32>
    %cst_18 = arith.constant dense<0.000000e+00> : vector<16x128xf32>
    %42 = tpu.matmul %40, %41, %cst_18 {dimension_numbers = #tpu.dot_dimension_numbers<[1], [0], [0], [1], [0, 0, 1, 1], [], []>} : vector<16x384xf32>, vector<384x128xf32>, vector<16x128xf32> -> vector<16x128xf32>
    %43 = vector.extract_strided_slice %2 {offsets = [2, 0], sizes = [1, 128], strides = [1, 1]} : vector<8x128xf32> to vector<1x128xf32>
    %44 = vector.broadcast %43 : vector<1x128xf32> to vector<16x128xf32>
    %45 = arith.mulf %42, %44 : vector<16x128xf32>
    %46 = vector.extract_strided_slice %2 {offsets = [3, 0], sizes = [1, 128], strides = [1, 1]} : vector<8x128xf32> to vector<1x128xf32>
    %47 = vector.broadcast %46 : vector<1x128xf32> to vector<16x128xf32>
    %48 = arith.addf %45, %47 : vector<16x128xf32>
    %cst_19 = arith.constant 0.000000e+00 : f32
    %49 = vector.broadcast %cst_19 : f32 to vector<16x128xf32>
    %50 = arith.maximumf %48, %49 : vector<16x128xf32>
    %c0_20 = arith.constant 0 : index
    %c0_21 = arith.constant 0 : index
    %51 = vector.load %arg6[%c0_20, %c0_21] : memref<128x128xf32, #tpu.memory_space<vmem>>, vector<128x128xf32>
    %cst_22 = arith.constant dense<0.000000e+00> : vector<16x128xf32>
    %52 = tpu.matmul %33, %51, %cst_22 {dimension_numbers = #tpu.dot_dimension_numbers<[1], [0], [0], [1], [0, 0, 1, 1], [], []>} : vector<16x128xf32>, vector<128x128xf32>, vector<16x128xf32> -> vector<16x128xf32>
    %53 = vector.extract_strided_slice %2 {offsets = [6, 0], sizes = [1, 128], strides = [1, 1]} : vector<8x128xf32> to vector<1x128xf32>
    %54 = vector.broadcast %53 : vector<1x128xf32> to vector<16x128xf32>
    %55 = arith.mulf %52, %54 : vector<16x128xf32>
    %56 = vector.extract_strided_slice %2 {offsets = [7, 0], sizes = [1, 128], strides = [1, 1]} : vector<8x128xf32> to vector<1x128xf32>
    %57 = vector.broadcast %56 : vector<1x128xf32> to vector<16x128xf32>
    %58 = arith.addf %55, %57 : vector<16x128xf32>
    %cst_23 = arith.constant 0.000000e+00 : f32
    %59 = vector.broadcast %cst_23 : f32 to vector<16x128xf32>
    %60 = arith.maximumf %58, %59 : vector<16x128xf32>
    %61 = arith.addf %50, %60 : vector<16x128xf32>
    %c0_24 = arith.constant 0 : index
    %c0_25 = arith.constant 0 : index
    %c0_26 = arith.constant 0 : index
    %62 = vector.load %arg8[%c0_24, %c0_25, %c0_26] : memref<1x16x128xf32, #tpu.memory_space<vmem>>, vector<1x16x128xf32>
    %63 = vector.shape_cast %62 : vector<1x16x128xf32> to vector<16x128xf32>
    %64 = vector.shape_cast %61 : vector<16x128xf32> to vector<1x16x128xf32>
    tpu.vector_store %arg8[%c0_24, %c0_25, %c0_26], %64 {strides = array<i32>} : memref<1x16x128xf32, #tpu.memory_space<vmem>>, vector<1x16x128xf32>,
    return
  }
  func.func @transform_0(%arg0: i32) -> (i32, i32, i32) {
    %c0_i32 = arith.constant 0 : i32
    %c0_i32_0 = arith.constant 0 : i32
    %c0_i32_1 = arith.constant 0 : i32
    return %arg0, %c0_i32, %c0_i32_0 : i32, i32, i32
  }
  func.func @transform_1(%arg0: i32) -> (i32, i32) {
    %c0_i32 = arith.constant 0 : i32
    %c0_i32_0 = arith.constant 0 : i32
    %c0_i32_1 = arith.constant 0 : i32
    return %c0_i32, %c0_i32_0 : i32, i32
  }
  func.func @transform_2(%arg0: i32) -> (i32, i32) {
    %c0_i32 = arith.constant 0 : i32
    %c0_i32_0 = arith.constant 0 : i32
    %c0_i32_1 = arith.constant 0 : i32
    return %c0_i32, %c0_i32_0 : i32, i32
  }
  func.func @transform_3(%arg0: i32) -> (i32, i32) {
    %c0_i32 = arith.constant 0 : i32
    %c0_i32_0 = arith.constant 0 : i32
    %c0_i32_1 = arith.constant 0 : i32
    return %c0_i32, %c0_i32_0 : i32, i32
  }
  func.func @transform_4(%arg0: i32) -> (i32, i32) {
    %c0_i32 = arith.constant 0 : i32
    %c0_i32_0 = arith.constant 0 : i32
    %c0_i32_1 = arith.constant 0 : i32
    return %c0_i32, %c0_i32_0 : i32, i32
  }
  func.func @transform_5(%arg0: i32) -> (i32, i32) {
    %c0_i32 = arith.constant 0 : i32
    %c0_i32_0 = arith.constant 0 : i32
    %c0_i32_1 = arith.constant 0 : i32
    return %c0_i32, %c0_i32_0 : i32, i32
  }
  func.func @transform_6(%arg0: i32) -> (i32, i32) {
    %c0_i32 = arith.constant 0 : i32
    %c0_i32_0 = arith.constant 0 : i32
    %c0_i32_1 = arith.constant 0 : i32
    return %c0_i32, %c0_i32_0 : i32, i32
  }
  func.func @transform_7(%arg0: i32) -> (i32, i32, i32) {
    %c0_i32 = arith.constant 0 : i32
    %c0_i32_0 = arith.constant 0 : i32
    %c0_i32_1 = arith.constant 0 : i32
    return %arg0, %c0_i32, %c0_i32_0 : i32, i32, i32
  }
}

</mosaic_0001>

<bundles_post_ra>
// kernel: fwd.1
= control target key start
LH: loop header
LB: loop body
LE: loop exit
PB: predicated region body
PF: predicated region fallthrough
CT: control target
= control target key end

     0   :  { %12 = vsyncpa [#allocation3], 0  ;;  %s1297_s0 = inlined_call_operand.vmem [shape: f32[2,8,32], index: 0, kind: input, shape index: {}]   ;;  %s1298_s1 = inlined_call_operand.hbm [shape: f32[16,8], index: 1, kind: input, shape index: {}]   ;;  %s1299_s2 = inlined_call_operand.vmem [shape: f32[16,2], index: 2, kind: input, shape index: {}]   ;;  %s1300_s3 = inlined_call_operand.vmem [shape: f32[96,256], index: 3, kind: input, shape index: {}]   ;;  %s1301_s4 = inlined_call_operand.hbm [shape: f32[384,128], index: 4, kind: input, shape index: {}]   ;;  %s1302_s5 = inlined_call_operand.hbm [shape: f32[128,128], index: 5, kind: input, shape index: {}]   ;;  %s1303_s6 = inlined_call_operand.hbm [shape: f32[8,128], index: 6, kind: input, shape index: {}]   ;;  %s1304_s7 = inlined_call_operand.vmem [shape: f32[2,16,128], index: 7, kind: output, shape index: {}]  }
   0x1   :  { %13 = vsyncpa [#allocation5], 0 }
   0x2   :  { %14 = vsyncpa [#allocation8], 0  ;;  %s1083_s24 = smov 0  }
   0x3 LB: > { %s1089_s25 = sadd.s32 4294967295, %s1031_s24   ;;  %p812_p0 = scmp.ge.s32.totalorder %s1031_s24, 1  ;;  %s1031_s24 = sphi %s1083_s24, %s20_s24  }
   0x4   : > { %p203_p1 = scmp.lt.s32.totalorder %s1031_s24, 3  ;;  %p864_p2 = scmp.eq.s32.totalorder %s1089_s25, 0 }
   0x5   : > { %s234_s28 = sshll.u32 %s1301_s4, 4  ;;  %s214_s9 = sshll.u32 %s1298_s1, 4  ;;  %s235_s28 = int_to_ptr.hbm [resolvable:$true] %s234_s28  ;;  %s215_s9 = int_to_ptr.hbm [resolvable:$true] %s214_s9 }
   0x6   : > { %p1097_p3 = pnand %p812_p0, %p203_p1  ;;  %s1033_s10 = smov [#allocation4]  }
   0x7   : > { %s236_s11 = sshll.u32 %s1033_s10, 4  ;;  %s1034_s13 = smov [#allocation2]   ;;  %s237_s11 = int_to_ptr.vmem [resolvable:$true] %s236_s11 }
   0x8   : > { %p851_p4 = pneg %p1097_p3  ;;  %s216_s14 = sshll.u32 %s1034_s13, 4  ;;  %s217_s14 = int_to_ptr.vmem [resolvable:$true] %s216_s14 }
   0x9   : > { %s248_s17 = sshll.u32 %s1302_s5, 4  ;;  %s1035_s18 = smov 128   ;;  %s249_s17 = int_to_ptr.hbm [resolvable:$true] %s248_s17 }
   0xa   : > { %p1108_p5 = pnand %p864_p2, %p851_p4  ;;  %s1036_s19 = smov 8  }
   0xb   : > { %s1037_s20 = smov [#allocation6]   ;;  %s263_s26 = sshll.u32 %s1303_s6, 4  ;;  %s264_s26 = int_to_ptr.hbm [resolvable:$true] %s263_s26 }
   0xc   : > { %857 = dma.hbm_to_vmem [thread:$0]  (!%p1108_p5), %s235_s28, 6144, %s237_s11, [#allocation5], %s1035_s18, %s1035_s18, %s1036_s19  }
   0xd   : > { %854 = dma.hbm_to_vmem [thread:$0]  (!%p1108_p5), %s215_s9, 256, %s217_s14, [#allocation3], %s1035_s18, %s1035_s18, %s1036_s19  }
   0xe   : > { %s250_s21 = sshll.u32 %s1037_s20, 4  ;;  %s1038_s27 = smov [#allocation7]   ;;  %s251_s21 = int_to_ptr.vmem [resolvable:$true] %s250_s21 }
   0xf   : > { %860 = dma.hbm_to_vmem [thread:$0]  (!%p1108_p5), %s249_s17, 2048, %s251_s21, [#allocation5], %s1035_s18, %s1035_s18, %s1036_s19  }
  0x10   : > { %s265_s30 = sshll.u32 %s1038_s27, 4  ;;  %285 = sbr.rel (%p1097_p3) target bundleno = 578 (0x242), region = 48  ;;  %s266_s30 = int_to_ptr.vmem [resolvable:$true] %s265_s30 }
  0x11   : > { %863 = dma.hbm_to_vmem [thread:$0]  (!%p1108_p5), %s264_s26, 128, %s266_s30, [#allocation8]  }
  0x15   : > { %1018 = dma.done.wait (%p864_p2), [#allocation3], 256  }
  0x16   : > { %1020 = vsyncadd (%p864_p2), [#allocation3], 4294967040 }
  0x17   : > { %1022 = dma.done.wait (%p864_p2), [#allocation5], 8192  }
  0x18   : > { %1024 = vsyncadd (%p864_p2), [#allocation5], 4294959104 }
  0x19   : > { %1026 = dma.done.wait (%p864_p2), [#allocation8], 128  }
  0x1a   : > { %1028 = vsyncadd (%p864_p2), [#allocation8], 4294967168  ;;  %p332_p6 = scmp.lt.s32.totalorder %s1089_s25, 1  ;;  %v1039_v0 = vmov 1   ;;  %v1040_v1 = vmov 0   ;;  %vm347_vm0 = vcmask 64512   ;;  %v379_v18 = vlaneseq }
  0x1b   : > { %890 = vset.pattern.permute.xlu0 %v1039_v0  ;;  %891 = vset.pattern.permute.xlu1 %v1040_v1  ;;  %v345_v3 = vld [vmem:[#allocation2] sm:$0xff]  ;;  %v344_v5 = vld [vmem:[%s1299_s2 + $0x8] sm:$0xff]  ;;  %v455_v7 = vld [vmem:[%s1300_s3 + $0xb0] sm:$0xff]  ;;  %s1041_s13 = smov 32   ;;  %s1042_s14 = smov 64   ;;  %vm427_vm3 = vcmask 261120  }
  0x1c   : > { %s1308_s25 = smov (!%p332_p6, %s1089_s25), 1  ;;  %892 = vset.pattern.permute.xlu2 %v1040_v1  ;;  %v343_v4 = vld [vmem:[%s1299_s2] sm:$0xff]  ;;  %v346_v6 = vld [vmem:[#allocation2 + $0x8] sm:$0xff]  ;;  %v456_v8 = vld [vmem:[%s1300_s3 + $0xb8] sm:$0xff]  ;;  %468 = vmatpush.msra.mxu1 %v455_v7  ;;  %v1189_v20 = vshrl.u32 %v379_v18, 7  ;;  %vm430_vm4 = vcmask 523264  }
  0x1d   : > { %s823_s28 = sshll.u32 %s1308_s25, 3  ;;  %402 = vperm.xlu0 %890, %v343_v4   ;;  %386 = vperm.xlu1 %891, %v343_v4   ;;  %v453_v9 = vld [vmem:[%s1300_s3 + $0xa0] sm:$0xff]  ;;  %v454_v10 = vld [vmem:[%s1300_s3 + $0xa8] sm:$0xff]  ;;  %v451_v11 = vld [vmem:[%s1300_s3 + $0x90] sm:$0xff]  ;;  %vm457_vm5 = vcmask 785408   ;;  %s834_s22 = sshll.u32 %s1308_s25, 4 }
  0x1e   : > { %s335_s9 = scalar_lea.vmem %s1297_s0, %s823_s28  ;;  %491 = vmatpush.msra.mxu2 %v456_v8  ;;  %v452_v12 = vld [vmem:[%s1300_s3 + $0x98] sm:$0xff]  ;;  %469 = vmatpush.msra.mxu1 %v453_v9  ;;  %v449_v13 = vld [vmem:[%s1300_s3 + $0x80] sm:$0xff]  ;;  %v450_v14 = vld [vmem:[%s1300_s3 + $0x88] sm:$0xff]  ;;  %vm398_vm1 = vcmp.lt.s32.totalorder %v1189_v20, 7  ;;  %vm381_vm2 = vcmp.lt.s32.totalorder %v1189_v20, 1  ;;  %s340_s27 = scalar_lea.vmem %s1304_s7, %s834_s22 }
  0x1f   : > { %v341_v2 = vld [vmem:[%s335_s9] sm:$0xff]  ;;  %v447_v15 = vld [vmem:[%s1300_s3 + $0x70] sm:$0xff]  ;;  %v448_v16 = vld [vmem:[%s1300_s3 + $0x78] sm:$0xff] }
  0x20   : > { %369 = vmatpush.msra.mxu0 %v341_v2  ;;  %492 = vmatpush.msra.mxu2 %v454_v10  ;;  %v445_v29 = vld [vmem:[%s1300_s3 + $0x60] sm:$0xff]  ;;  %v446_v30 = vld [vmem:[%s1300_s3 + $0x68] sm:$0xff]  ;;  %v443_v31 = vld [vmem:[%s1300_s3 + $0x50] sm:$0xff] }
  0x21   : > { %826 = vmatmul.msk.f32.vlgmr.msra.gmra.mxu0 %vm347_vm0, %v345_v3  ;;  %470 = vmatpush.msra.mxu1 %v451_v11  ;;  %v444_v32 = vld [vmem:[%s1300_s3 + $0x58] sm:$0xff]  ;;  %v441_v33 = vld [vmem:[%s1300_s3 + $0x40] sm:$0xff]  ;;  %v442_v34 = vld [vmem:[%s1300_s3 + $0x48] sm:$0xff] }
  0x22   : > { %493 = vmatpush.msra.mxu2 %v452_v12  ;;  %v439_v35 = vld [vmem:[%s1300_s3 + $0x30] sm:$0xff]  ;;  %v440_v36 = vld [vmem:[%s1300_s3 + $0x38] sm:$0xff]  ;;  %v437_v37 = vld [vmem:[%s1300_s3 + $0x20] sm:$0xff] }
  0x23   : > { %471 = vmatpush.msra.mxu1 %v449_v13  ;;  %v438_v38 = vld [vmem:[%s1300_s3 + $0x28] sm:$0xff]  ;;  %v435_v39 = vld [vmem:[%s1300_s3 + $0x10] sm:$0xff]  ;;  %v436_v40 = vld [vmem:[%s1300_s3 + $0x18] sm:$0xff] }
  0x24   : > { %494 = vmatpush.msra.mxu2 %v450_v14  ;;  %v433_v41 = vld [vmem:[%s1300_s3] sm:$0xff]  ;;  %v434_v42 = vld [vmem:[%s1300_s3 + $0x8] sm:$0xff]  ;;  %v567_v46 = vld [vmem:[#allocation4 + $0xe8] sm:$0xff] }
  0x25   : > { %406 = vperm.xlu0 %890, %v344_v5   ;;  %472 = vmatpush.msra.mxu1 %v447_v15  ;;  %v569_v43 = vld [vmem:[#allocation4 + $0xf8] sm:$0xff]  ;;  %v568_v44 = vld [vmem:[#allocation4 + $0xf0] sm:$0xff]  ;;  %v676_v48 = vld [vmem:[#allocation6 + $0x68] sm:$0xff] }
  0x26   : > { %495 = vmatpush.msra.mxu2 %v448_v16  ;;  %609 = vmatpush.msrb.mxu0 %v569_v43  ;;  %v678_v45 = vld [vmem:[#allocation6 + $0x78] sm:$0xff]  ;;  %v677_v47 = vld [vmem:[#allocation6 + $0x70] sm:$0xff]  ;;  %v566_v49 = vld [vmem:[#allocation4 + $0xe0] sm:$0xff] }
  0x27   : > { %473 = vmatpush.msra.mxu1 %v445_v29  ;;  %v675_v50 = vld [vmem:[#allocation6 + $0x60] sm:$0xff]  ;;  %v553_v51 = vld [vmem:[#allocation4 + $0x78] sm:$0xff]  ;;  %v552_v54 = vld [vmem:[#allocation4 + $0x70] sm:$0xff] }
  0x28   : > { %496 = vmatpush.msra.mxu2 %v446_v30  ;;  %610 = vmatpush.msrb.mxu0 %v568_v44  ;;  %v585_v52 = vld [vmem:[#allocation4 + $0x178] sm:$0xff]  ;;  %v584_v55 = vld [vmem:[#allocation4 + $0x170] sm:$0xff]  ;;  %v551_v57 = vld [vmem:[#allocation4 + $0x68] sm:$0xff] }
  0x29   : > { %827 = vmatmul.msk.f32.gmra.mxu0 %vm347_vm0, %v346_v6  ;;  %474 = vmatpush.msra.mxu1 %v443_v31  ;;  %v565_v53 = vld [vmem:[#allocation4 + $0xd8] sm:$0xff]  ;;  %v564_v58 = vld [vmem:[#allocation4 + $0xd0] sm:$0xff]  ;;  %v583_v59 = vld [vmem:[#allocation4 + $0x168] sm:$0xff] }
  0x2a   : > { %497 = vmatpush.msra.mxu2 %v444_v32  ;;  %611 = vmatpush.msrb.mxu0 %v567_v46  ;;  %v674_v56 = vld [vmem:[#allocation6 + $0x58] sm:$0xff]  ;;  %v673_v62 = vld [vmem:[#allocation6 + $0x50] sm:$0xff]  ;;  %v550_v63 = vld [vmem:[#allocation4 + $0x60] sm:$0xff] }
  0x2b   : > { %475 = vmatpush.msra.mxu1 %v441_v33  ;;  %586 = vmatpush.msra.mxu3 %v553_v51  ;;  %v563_v0 = vld [vmem:[#allocation4 + $0xc8] sm:$0xff]  ;;  %v582_v1 = vld [vmem:[#allocation4 + $0x160] sm:$0xff]  ;;  %v561_v7 = vld [vmem:[#allocation4 + $0xb8] sm:$0xff] }
  0x2c   : > { %498 = vmatpush.msra.mxu2 %v442_v34  ;;  %612 = vmatpush.msrb.mxu0 %v566_v49  ;;  %v672_v3 = vld [vmem:[#allocation6 + $0x48] sm:$0xff]  ;;  %v562_v4 = vld [vmem:[#allocation4 + $0xc0] sm:$0xff]  ;;  %v670_v9 = vld [vmem:[#allocation6 + $0x38] sm:$0xff] }
  0x2d   : > { %476 = vmatpush.msra.mxu1 %v439_v35  ;;  %587 = vmatpush.msra.mxu3 %v552_v54  ;;  %v671_v6 = vld [vmem:[#allocation6 + $0x40] sm:$0xff]  ;;  %v560_v11 = vld [vmem:[#allocation4 + $0xb0] sm:$0xff]  ;;  %v559_v14 = vld [vmem:[#allocation4 + $0xa8] sm:$0xff] }
  0x2e   : > { %499 = vmatpush.msra.mxu2 %v440_v36  ;;  %613 = vmatpush.msrb.mxu0 %v565_v53  ;;  %v558_v16 = vld [vmem:[#allocation4 + $0xa0] sm:$0xff]  ;;  %v549_v29 = vld [vmem:[#allocation4 + $0x58] sm:$0xff]  ;;  %v556_v31 = vld [vmem:[#allocation4 + $0x90] sm:$0xff] }
  0x2f   : > { %477 = vmatpush.msra.mxu1 %v437_v37  ;;  %588 = vmatpush.msra.mxu3 %v551_v57  ;;  %v581_v30 = vld [vmem:[#allocation4 + $0x158] sm:$0xff]  ;;  %v668_v32 = vld [vmem:[#allocation6 + $0x28] sm:$0xff]  ;;  %v548_v33 = vld [vmem:[#allocation4 + $0x50] sm:$0xff] }
  0x30   : > { %500 = vmatpush.msra.mxu2 %v438_v38  ;;  %614 = vmatpush.msrb.mxu0 %v564_v58  ;;  %v580_v34 = vld [vmem:[#allocation4 + $0x150] sm:$0xff]  ;;  %v555_v35 = vld [vmem:[#allocation4 + $0x88] sm:$0xff]  ;;  %v667_v36 = vld [vmem:[#allocation6 + $0x20] sm:$0xff] }
  0x31   : > { %478 = vmatpush.msra.mxu1 %v435_v39  ;;  %589 = vmatpush.msra.mxu3 %v550_v63  ;;  %v547_v37 = vld [vmem:[#allocation4 + $0x48] sm:$0xff]  ;;  %v554_v39 = vld [vmem:[#allocation4 + $0x80] sm:$0xff]  ;;  %v665_v43 = vld [vmem:[#allocation6 + $0x10] sm:$0xff] }
  0x32   : > { %501 = vmatpush.msra.mxu2 %v436_v40  ;;  %615 = vmatpush.msrb.mxu0 %v563_v0  ;;  %v579_v38 = vld [vmem:[#allocation4 + $0x148] sm:$0xff]  ;;  %v666_v40 = vld [vmem:[#allocation6 + $0x18] sm:$0xff]  ;;  %v663_v49 = vld [vmem:[#allocation6] sm:$0xff] }
  0x33   : > { %479 = vmatpush.msra.mxu1 %v433_v41  ;;  %590 = vmatpush.msra.mxu3 %v549_v29  ;;  %v546_v41 = vld [vmem:[#allocation4 + $0x40] sm:$0xff]  ;;  %v545_v44 = vld [vmem:[#allocation4 + $0x38] sm:$0xff]  ;;  %v664_v46 = vld [vmem:[#allocation6 + $0x8] sm:$0xff] }
  0x34   : > { %502 = vmatpush.msra.mxu2 %v434_v42  ;;  %616 = vmatpush.msrb.mxu0 %v562_v4  ;;  %v578_v42 = vld [vmem:[#allocation4 + $0x140] sm:$0xff]  ;;  %v575_v51 = vld [vmem:[#allocation4 + $0x128] sm:$0xff]  ;;  %v541_v54 = vld [vmem:[#allocation4 + $0x18] sm:$0xff] }
  0x35   : > { %632 = vmatpush.msrb.mxu1 %v585_v52  ;;  %591 = vmatpush.msra.mxu3 %v548_v33  ;;  %v542_v52 = vld [vmem:[#allocation4 + $0x20] sm:$0xff]  ;;  %v572_v57 = vld [vmem:[#allocation4 + $0x110] sm:$0xff]  ;;  %v539_v58 = vld [vmem:[#allocation4 + $0x8] sm:$0xff] }
  0x36   : > { %679 = vmatpush.msrb.mxu2 %v678_v45  ;;  %617 = vmatpush.msrb.mxu0 %v561_v7  ;;  %v577_v45 = vld [vmem:[#allocation4 + $0x138] sm:$0xff]  ;;  %v574_v53 = vld [vmem:[#allocation4 + $0x120] sm:$0xff] }
  0x37   : > { %633 = vmatpush.msrb.mxu1 %v584_v55  ;;  %592 = vmatpush.msra.mxu3 %v547_v37  ;;  %v573_v55 = vld [vmem:[#allocation4 + $0x118] sm:$0xff]  ;;  %v1268_v63 = vld [vmem:[#allocation7] sm:$0xff] }
  0x38   : > { %680 = vmatpush.msrb.mxu2 %v677_v47  ;;  %618 = vmatpush.msrb.mxu0 %v560_v11  ;;  %v544_v47 = vld [vmem:[#allocation4 + $0x30] sm:$0xff]  ;;  %v510_v0 = vperm.slane %v1268_v63, 0  ;;  %v521_v7 = vperm.slane %v1268_v63, 5  ;;  %v655_v20 = vperm.slane %v1268_v63, 2 }
  0x39   : > { %634 = vmatpush.msrb.mxu1 %v583_v59  ;;  %593 = vmatpush.msra.mxu3 %v546_v41  ;;  %v571_v59 = vld [vmem:[#allocation4 + $0x108] sm:$0xff] }
  0x3a   : > { %681 = vmatpush.msrb.mxu2 %v676_v48  ;;  %619 = vmatpush.msrb.mxu0 %v559_v14  ;;  %v576_v48 = vld [vmem:[#allocation4 + $0x130] sm:$0xff] }
  0x3b   : > { %635 = vmatpush.msrb.mxu1 %v582_v1  ;;  %594 = vmatpush.msra.mxu3 %v545_v44  ;;  %v513_v1 = vperm.slane %v1268_v63, 1 }
  0x3c   : > { %682 = vmatpush.msrb.mxu2 %v675_v50  ;;  %620 = vmatpush.msrb.mxu0 %v558_v16  ;;  %v543_v50 = vld [vmem:[#allocation4 + $0x28] sm:$0xff] }
  0x3d   : > { %636 = vmatpush.msrb.mxu1 %v581_v30  ;;  %595 = vmatpush.msra.mxu3 %v544_v47 }
  0x3e   : > { %683 = vmatpush.msrb.mxu2 %v674_v56  ;;  %v540_v56 = vld [vmem:[#allocation4 + $0x10] sm:$0xff] }
  0x3f   : > { %637 = vmatpush.msrb.mxu1 %v580_v34  ;;  %596 = vmatpush.msra.mxu3 %v543_v50 }
  0x40   : > { %684 = vmatpush.msrb.mxu2 %v673_v62  ;;  %v570_v62 = vld [vmem:[#allocation4 + $0x100] sm:$0xff] }
  0x41   : > { %638 = vmatpush.msrb.mxu1 %v579_v38  ;;  %597 = vmatpush.msra.mxu3 %v542_v52 }
  0x42   : > { %685 = vmatpush.msrb.mxu2 %v672_v3 }
  0x43   : > { %639 = vmatpush.msrb.mxu1 %v578_v42  ;;  %598 = vmatpush.msra.mxu3 %v541_v54 }
  0x44   : > { %686 = vmatpush.msrb.mxu2 %v671_v6 }
  0x45   : > { %640 = vmatpush.msrb.mxu1 %v577_v45  ;;  %599 = vmatpush.msra.mxu3 %v540_v56 }
  0x46   : > { %687 = vmatpush.msrb.mxu2 %v670_v9 }
  0x47   : > { %641 = vmatpush.msrb.mxu1 %v576_v48  ;;  %600 = vmatpush.msra.mxu3 %v539_v58 }
  0x49   : > { %642 = vmatpush.msrb.mxu1 %v575_v51 }
  0x4b   : > { %643 = vmatpush.msrb.mxu1 %v574_v53 }
  0x4d   : > { %644 = vmatpush.msrb.mxu1 %v573_v55 }
  0x4f   : > { %645 = vmatpush.msrb.mxu1 %v572_v57 }
  0x51   : > { %646 = vmatpush.msrb.mxu1 %v571_v59 }
  0x53   : > { %647 = vmatpush.msrb.mxu1 %v570_v62 }
  0x8f   : > { %v1186_v19 = vpop.permute.xlu0 %402  ;;  %v1248_v61 = vpop.permute.xlu1 %386 }
  0x97   : > { %v1197_v24 = vpop.permute.xlu0 %406 }
  0x9e   : > { %v1184_v17 = vpop.f32.mrf.mxu0 }
  0x9f   : > { %413 = vrot.lane.b32.xlu1 %v1184_v17, %s1041_s13  ;;  %v396_v22 = vrot.slane %v1184_v17, 1  ;;  %v377_v2 = vrot.slane %v1184_v17, 7 }
  0xa6   : > { %v1191_v21 = vpop.f32.mrf.mxu0 }
  0xa7   : > { %v397_v23 = vrot.slane %v1191_v21, 1  ;;  %415 = vrot.lane.b32.xlu0 %v1191_v21, %s1041_s13  ;;  %v378_v60 = vrot.slane %v1191_v21, 7 }
  0xa9   : > { %v400_v25 = vsel %vm398_vm1, %v397_v23, %v396_v22  ;;  %v399_v26 = vsel %vm398_vm1, %v396_v22, %v397_v23  ;;  %v382_v18 = vsel %vm381_vm2, %v377_v2, %v378_v60 }
  0xaa   : > { %v410_v27 = vmul.f32 %v1197_v24, %v400_v25  ;;  %v409_v28 = vmul.f32 %v1186_v19, %v399_v26 }
  0xac   : > { %423 = vrot.lane.b32.xlu1 %v410_v27, %s1042_s14  ;;  %421 = vrot.lane.b32.xlu2 %v409_v28, %s1042_s14  ;;  %v557_v27 = vld [vmem:[#allocation4 + $0x98] sm:$0xff]  ;;  %v669_v28 = vld [vmem:[#allocation6 + $0x30] sm:$0xff] }
  0xad   : > { %621 = vmatpush.msrb.mxu0 %v557_v27  ;;  %688 = vmatpush.msrb.mxu2 %v669_v28 }
  0xaf   : > { %622 = vmatpush.msrb.mxu0 %v556_v31  ;;  %689 = vmatpush.msrb.mxu2 %v668_v32 }
  0xb1   : > { %623 = vmatpush.msrb.mxu0 %v555_v35  ;;  %690 = vmatpush.msrb.mxu2 %v667_v36 }
  0xb3   : > { %624 = vmatpush.msrb.mxu0 %v554_v39  ;;  %691 = vmatpush.msrb.mxu2 %v666_v40  ;;  %v705_v40 = vperm.slane %v1268_v63, 7 }
  0xb4   : > { %391 = vperm.xlu2 %892, %v344_v5   ;;  %v383_v5 = vsel %vm381_vm2, %v378_v60, %v377_v2  ;;  %v538_v60 = vld [vmem:[#allocation4] sm:$0xff] }
  0xb5   : > { %v394_v10 = vmul.f32 %v1248_v61, %v383_v5  ;;  %692 = vmatpush.msrb.mxu2 %v665_v43  ;;  %601 = vmatpush.msra.mxu3 %v538_v60  ;;  %v518_v5 = vperm.slane %v1268_v63, 4 }
  0xb7   : > { %693 = vmatpush.msrb.mxu2 %v664_v46 }
  0xb9   : > { %694 = vmatpush.msrb.mxu2 %v663_v49 }
 0x106   : > { %v422_v8 = vpop.permute.xlu2 %421 }
 0x10e   : > { %v1259_v17 = vpop.permute.xlu2 %391 }
 0x10f   : > { %v395_v22 = vmul.f32 %v1259_v17, %v382_v18 }
 0x111   : > { %v414_v12 = vpop.permute.xlu1 %413 }
 0x112   : > { %v428_v13 = vsel %vm427_vm3, %v394_v10, %v414_v12 }
 0x113   : > { %v431_v15 = vsel %vm430_vm4, %v428_v13, %v422_v8 }
 0x114   : > { %828 = vmatmul.msk.f32.vlgmr.msra.gmra.mxu1 %vm457_vm5, %v431_v15  ;;  %830 = vmatmul.msk.f32.vlgmr.msra.gmra.mxu2 %vm457_vm5, %v431_v15 }
 0x119   : > { %v416_v21 = vpop.permute.xlu0 %415 }
 0x11a   : > { %v429_v23 = vsel %vm427_vm3, %v395_v22, %v416_v21 }
 0x11e   : > { %v424_v25 = vpop.permute.xlu1 %423 }
 0x11f   : > { %v432_v26 = vsel %vm430_vm4, %v429_v23, %v424_v25 }
 0x120   : > { %829 = vmatmul.msk.f32.gmra.mxu1 %vm457_vm5, %v432_v26  ;;  %831 = vmatmul.msk.f32.gmra.mxu2 %vm457_vm5, %v432_v26 }
 0x191   : > { %v481_v2 = vpop.f32.mrf.mxu1 }
 0x192   : > { %v511_v3 = vmul.f32 %v510_v0, %v481_v2 }
 0x194   : > { %v514_v4 = vadd.f32 %v513_v1, %v511_v3 }
 0x196   : > { %v516_v6 = vmax.f32 %v514_v4, 0.0 }
 0x197   : > { %v504_v8 = vpop.f32.mrf.mxu2 }
 0x198   : > { %v519_v9 = vmul.f32 %v518_v5, %v504_v8  ;;  %625 = vmatmul.f32.vlgmr.msrb.gmra.mxu0 %v516_v6  ;;  %v532_v16 = vrot.slane %v516_v6, 1  ;;  %v526_v23 = vrot.slane %v516_v6, 7 }
 0x19a   : > { %v522_v10 = vadd.f32 %v521_v7, %v519_v9 }
 0x19c   : > { %v524_v11 = vmax.f32 %v522_v10, 0.0 }
 0x19d   : > { %v484_v12 = vpop.f32.mrf.mxu1 }
 0x19e   : > { %v512_v13 = vmul.f32 %v510_v0, %v484_v12  ;;  %695 = vmatmul.f32.vlgmr.msrb.gmra.mxu2 %v524_v11 }
 0x1a0   : > { %v515_v14 = vadd.f32 %v513_v1, %v512_v13 }
 0x1a2   : > { %v517_v15 = vmax.f32 %v515_v14, 0.0 }
 0x1a3   : > { %v507_v18 = vpop.f32.mrf.mxu2 }
 0x1a4   : > { %v533_v21 = vrot.slane %v517_v15, 1  ;;  %v520_v22 = vmul.f32 %v518_v5, %v507_v18  ;;  %628 = vmatmul.f32.gmra.mxu0 %v517_v15  ;;  %v527_v25 = vrot.slane %v517_v15, 7 }
 0x1a6   : > { %v529_v26 = vsel %vm381_vm2, %v527_v25, %v526_v23  ;;  %v534_v27 = vsel %vm398_vm1, %v532_v16, %v533_v21  ;;  %v523_v28 = vadd.f32 %v521_v7, %v520_v22  ;;  %v528_v32 = vsel %vm381_vm2, %v526_v23, %v527_v25 }
 0x1a7   : > { %v530_v29 = vmul.f32 %v529_v26, %v1248_v61  ;;  %v536_v30 = vmul.f32 %v534_v27, %v1186_v19  ;;  %v535_v33 = vsel %vm398_vm1, %v533_v21, %v532_v16  ;;  %v531_v34 = vmul.f32 %v528_v32, %v1259_v17 }
 0x1a8   : > { %v525_v31 = vmax.f32 %v523_v28, 0.0  ;;  %v537_v35 = vmul.f32 %v535_v33, %v1197_v24  ;;  %v702_v61 = vperm.slane %v1268_v63, 6  ;;  %v658_v17 = vperm.slane %v1268_v63, 3 }
 0x1a9   : > { %602 = vmatmul.f32.vlgmr.msra.gmra.mxu3 %v530_v29  ;;  %648 = vmatmul.f32.vlgmr.msrb.gmra.mxu1 %v536_v30 }
 0x1aa   : > { %698 = vmatmul.f32.gmra.mxu2 %v525_v31 }
 0x1b1   : > { %605 = vmatmul.f32.gmra.mxu3 %v531_v34  ;;  %651 = vmatmul.f32.gmra.mxu1 %v537_v35 }
 0x215   : > { %v626_v36 = vpop.f32.mrf.mxu0 }
 0x221   : > { %v696_v19 = vpop.f32.mrf.mxu2  ;;  %v629_v46 = vpop.f32.mrf.mxu0 }
 0x222   : > { %v703_v39 = vmul.f32 %v702_v61, %v696_v19 }
 0x224   : > { %v706_v43 = vadd.f32 %v705_v40, %v703_v39 }
 0x226   : > { %v649_v37 = vpop.f32.mrf.mxu1  ;;  %v708_v48 = vmax.f32 %v706_v43, 0.0 }
 0x22c   : > { %v603_v38 = vpop.f32.mrf.mxu3 }
 0x22d   : > { %v627_v41 = vadd.f32 %v626_v36, %v603_v38  ;;  %v699_v44 = vpop.f32.mrf.mxu2 }
 0x22e   : > { %v704_v50 = vmul.f32 %v702_v61, %v699_v44  ;;  %v652_v52 = vpop.f32.mrf.mxu1 }
 0x22f   : > { %v650_v42 = vadd.f32 %v649_v37, %v627_v41 }
 0x230   : > { %v707_v55 = vadd.f32 %v705_v40, %v704_v50 }
 0x231   : > { %v656_v24 = vmul.f32 %v655_v20, %v650_v42 }
 0x232   : > { %v709_v58 = vmax.f32 %v707_v55, 0.0 }
 0x233   : > { %v659_v45 = vadd.f32 %v658_v17, %v656_v24 }
 0x234   : > { %v606_v47 = vpop.f32.mrf.mxu3 }
 0x235   : > { %v661_v49 = vmax.f32 %v659_v45, 0.0  ;;  %v630_v51 = vadd.f32 %v629_v46, %v606_v47 }
 0x237   : > { %v710_v53 = vadd.f32 %v708_v48, %v661_v49  ;;  %v653_v54 = vadd.f32 %v652_v52, %v630_v51 }
 0x239   : > { %712 = vst [vmem:[%s340_s27] sm:$0xff] %v710_v53  ;;  %v657_v56 = vmul.f32 %v655_v20, %v653_v54 }
 0x23b   : > { %v660_v57 = vadd.f32 %v658_v17, %v657_v56 }
 0x23d   : > { %v662_v59 = vmax.f32 %v660_v57, 0.0 }
 0x23f   : > { %v711_v60 = vadd.f32 %v709_v58, %v662_v59 }
 0x241   : > { %713 = vst [vmem:[%s340_s27 + $0x8] sm:$0xff] %v711_v60 }
 0x242 PF: > { %s20_s24 = sadd.s32 1, %s1031_s24  }
 0x243   : > { %p17_p7 = scmp.ge.s32.totalorder %s20_s24, 4  }
 0x245   :  { %19 = sbr.rel (!%p17_p7) target bundleno = 3 (0x3), region = 95 }
 0x24a   :  { %735 = vsyncpa [#allocation3], 1 }
 0x24b   :  { %737 = vsyncpa [#allocation3 + $0x1], 1 }
 0x24c   :  { %738 = vsyncpa [#allocation5], 1 }
 0x24d   :  { %739 = vsyncpa [#allocation8], 1 }

</bundles_post_ra>
